<compile_context>
chip_gen: v7x
topology: tpu7x:2x2x1
jax: 0.10.0
libtpu: 0.0.40
codegen_flags: <defaults>
</compile_context>

<pallas_src>
import functools

import jax
import jax.numpy as jnp
from jax import lax
from jax.experimental import pallas as pl
from jax.experimental.pallas import tpu as pltpu


def _dice_kernel(pred_ref, true_ref, inter_ref, union_ref, *,
                 tile_m, t_per, m_real, need_mask):
    i = pl.program_id(1)

    # Init the resident output blocks at the start of each parallel slice.
    @pl.when(i == 0)
    def _():
        inter_ref[...] = jnp.zeros_like(inter_ref)
        union_ref[...] = jnp.zeros_like(union_ref)

    p = pred_ref[...].astype(jnp.float32)   # (NC, tile_m)
    t = true_ref[...].astype(jnp.float32)

    if need_mask:
        # Global (unclamped) tile index; lanes past the real extent (ragged last
        # tile, or whole overhang tiles of the parallel split) contribute zero.
        g = pl.program_id(0) * t_per + i
        lane = lax.broadcasted_iota(jnp.int32, p.shape, 1)
        valid = (g * tile_m + lane) < m_real
        p = jnp.where(valid, p, 0.0)
        t = jnp.where(valid, t, 0.0)

    inter_ref[...] += jnp.sum(p * t, axis=1, keepdims=True)
    union_ref[...] += jnp.sum(p + t, axis=1, keepdims=True)


def dice_loss(y_pred, y_true, smooth=1.0, *,
              tile_m_cap=8192, vmem_budget_bytes=8 * 1024 * 1024,
              num_parallel=2):
    """Pallas implementation of DiceLoss.forward for NCHW inputs."""
    assert y_pred.shape == y_true.shape
    n, c, h, w = y_pred.shape
    nc = n * c
    m = h * w

    # Free, contiguous reshapes (no transpose, no dtype cast, no padding).
    p2 = y_pred.reshape(nc, m)
    t2 = y_true.reshape(nc, m)

    # Lane-tile size: as large as possible while the double-buffered input
    # footprint (2 inputs x 2 buffers) stays within the VMEM budget.
    cap = max(128, (int(tile_m_cap) // 128) * 128)
    bytes_per_lane = 2 * nc * (p2.dtype.itemsize + t2.dtype.itemsize)
    tile_m = max(128, min(cap, (vmem_budget_bytes // bytes_per_lane) // 128 * 128))
    if m <= tile_m:
        tile_m = m                                   # single full-extent tile
    t_total = (m + tile_m - 1) // tile_m
    n_par = max(1, min(num_parallel, t_total))       # parallel slices (v7x: 2 TCs)
    t_per = (t_total + n_par - 1) // n_par
    need_mask = (n_par * t_per * tile_m) != m
    need_clamp = (n_par * t_per) > t_total

    def in_index_map(p_idx, i):
        g = p_idx * t_per + i
        if need_clamp:
            g = jnp.minimum(g, t_total - 1)          # overhang tiles are re-read but fully masked
        return (0, g)

    kernel = functools.partial(_dice_kernel, tile_m=tile_m, t_per=t_per,
                               m_real=m, need_mask=need_mask)

    inter_p, union_p = pl.pallas_call(
        kernel,
        out_shape=(jax.ShapeDtypeStruct((n_par, nc, 1), jnp.float32),
                   jax.ShapeDtypeStruct((n_par, nc, 1), jnp.float32)),
        grid_spec=pltpu.PrefetchScalarGridSpec(
            num_scalar_prefetch=0,
            grid=(n_par, t_per),
            in_specs=[
                pl.BlockSpec((nc, tile_m), in_index_map),
                pl.BlockSpec((nc, tile_m), in_index_map),
            ],
            out_specs=(
                pl.BlockSpec((None, nc, 1), lambda p_idx, i: (p_idx, 0, 0)),
                pl.BlockSpec((None, nc, 1), lambda p_idx, i: (p_idx, 0, 0)),
            ),
        ),
        compiler_params=pltpu.CompilerParams(
            dimension_semantics=("parallel", "arbitrary")),
    )(p2, t2)

    # Tiny epilogue on (n_par, N*C) partials: fold parallel slices, fold batch,
    # then dice score and mean over channels.
    inter_c = jnp.sum(inter_p, axis=0)[:, 0].reshape(n, c).sum(axis=0)
    union_c = jnp.sum(union_p, axis=0)[:, 0].reshape(n, c).sum(axis=0)
    smooth = jnp.float32(smooth)
    dice = (2.0 * inter_c + smooth) / (union_c + smooth)
    return 1.0 - jnp.mean(dice)


def _dice_loss_ref(y_pred, y_true, smooth=1.0):
    y_pred = y_pred.astype(jnp.float32)
    y_true = y_true.astype(jnp.float32)
    inter = jnp.sum(y_pred * y_true, axis=(0, 2, 3))
    union = jnp.sum(y_pred, axis=(0, 2, 3)) + jnp.sum(y_true, axis=(0, 2, 3))
    dice = (2.0 * inter + smooth) / (union + smooth)
    return 1.0 - jnp.mean(dice)


if __name__ == "__main__":
    key = jax.random.PRNGKey(0)
    k1, k2, k3, k4 = jax.random.split(key, 4)

    # Test 1: module-spec shape (N=2, C=4, H=16, W=16), f32, single tile.
    y_pred = jax.nn.sigmoid(jax.random.normal(k1, (2, 4, 16, 16), jnp.float32))
    y_true = (jax.random.uniform(k2, (2, 4, 16, 16)) > 0.5).astype(jnp.float32)
    loss = dice_loss(y_pred, y_true, smooth=1.0)
    jax.block_until_ready(loss)
    ref = _dice_loss_ref(y_pred, y_true, smooth=1.0)
    assert jnp.allclose(loss, ref, atol=1e-5, rtol=1e-5), (loss, ref)

    # Test 2: multi-tile + parallel split + ragged last tile (mask & clamp paths).
    y_pred2 = jax.nn.sigmoid(jax.random.normal(k3, (2, 4, 48, 48), jnp.float32))
    y_true2 = (jax.random.uniform(k4, (2, 4, 48, 48)) > 0.5).astype(jnp.float32)
    loss2 = dice_loss(y_pred2, y_true2, smooth=1.0, tile_m_cap=512)
    jax.block_until_ready(loss2)
    ref2 = _dice_loss_ref(y_pred2, y_true2, smooth=1.0)
    assert jnp.allclose(loss2, ref2, atol=1e-5, rtol=1e-5), (loss2, ref2)

    # Test 3: native bf16 inputs (no wrapper upcast; cast happens in-kernel).
    loss3 = dice_loss(y_pred.astype(jnp.bfloat16), y_true.astype(jnp.bfloat16),
                      smooth=1.0)
    jax.block_until_ready(loss3)
    ref3 = _dice_loss_ref(y_pred.astype(jnp.bfloat16),
                          y_true.astype(jnp.bfloat16), smooth=1.0)
    assert jnp.allclose(loss3, ref3, atol=1e-4, rtol=1e-4), (loss3, ref3)

    print("KERNEL_OK")
</pallas_src>

<mosaic_0001>
module attributes {stable_mosaic.version = 11 : i64} {
  func.func @_dice_kernel(%arg0: i32, %arg1: i32, %arg2: memref<8x256xf32, #tpu.memory_space<vmem>>, %arg3: memref<8x256xf32, #tpu.memory_space<vmem>>, %arg4: memref<1x8x1xf32, #tpu.memory_space<vmem>>, %arg5: memref<1x8x1xf32, #tpu.memory_space<vmem>>) attributes {dimension_semantics = [#tpu.dimension_semantics<parallel>, #tpu.dimension_semantics<arbitrary>], iteration_bounds = array<i64: 1, 1>, scalar_prefetch = 0 : i64, scratch_operands = 0 : i64, tpu.core_type = #tpu.core_type<tc>, window_params = [{transform_indices = @transform_0, window_bounds = array<i64: 8, 256>}, {transform_indices = @transform_1, window_bounds = array<i64: 8, 256>}, {transform_indices = @transform_2, window_bounds = array<i64: 1, 8, 1>}, {transform_indices = @transform_3, window_bounds = array<i64: 1, 8, 1>}]} {
    %c0_i32 = arith.constant 0 : i32
    %0 = arith.cmpi eq, %arg1, %c0_i32 : i32
    %1 = arith.extui %0 : i1 to i32
    %c0_i32_0 = arith.constant 0 : i32
    %2 = arith.cmpi ne, %1, %c0_i32_0 : i32
    scf.if %2 {
      %cst_17 = arith.constant 0.000000e+00 : f32
      %23 = vector.broadcast %cst_17 : f32 to vector<8x1xf32>
      %c0_18 = arith.constant 0 : index
      %c0_19 = arith.constant 0 : index
      %c0_20 = arith.constant 0 : index
      %24 = vector.load %arg4[%c0_18, %c0_19, %c0_20] : memref<1x8x1xf32, #tpu.memory_space<vmem>>, vector<1x8x1xf32>
      %25 = vector.shape_cast %24 : vector<1x8x1xf32> to vector<8x1xf32>
      %26 = vector.shape_cast %23 : vector<8x1xf32> to vector<1x8x1xf32>
      tpu.vector_store %arg4[%c0_18, %c0_19, %c0_20], %26 {strides = array<i32>} : memref<1x8x1xf32, #tpu.memory_space<vmem>>, vector<1x8x1xf32>,
      %cst_21 = arith.constant 0.000000e+00 : f32
      %27 = vector.broadcast %cst_21 : f32 to vector<8x1xf32>
      %c0_22 = arith.constant 0 : index
      %c0_23 = arith.constant 0 : index
      %c0_24 = arith.constant 0 : index
      %28 = vector.load %arg5[%c0_22, %c0_23, %c0_24] : memref<1x8x1xf32, #tpu.memory_space<vmem>>, vector<1x8x1xf32>
      %29 = vector.shape_cast %28 : vector<1x8x1xf32> to vector<8x1xf32>
      %30 = vector.shape_cast %27 : vector<8x1xf32> to vector<1x8x1xf32>
      tpu.vector_store %arg5[%c0_22, %c0_23, %c0_24], %30 {strides = array<i32>} : memref<1x8x1xf32, #tpu.memory_space<vmem>>, vector<1x8x1xf32>,
    } else {
    }
    %c0 = arith.constant 0 : index
    %c0_1 = arith.constant 0 : index
    %3 = vector.load %arg2[%c0, %c0_1] : memref<8x256xf32, #tpu.memory_space<vmem>>, vector<8x256xf32>
    %c0_2 = arith.constant 0 : index
    %c0_3 = arith.constant 0 : index
    %4 = vector.load %arg3[%c0_2, %c0_3] : memref<8x256xf32, #tpu.memory_space<vmem>>, vector<8x256xf32>
    %c0_4 = arith.constant 0 : index
    %c0_5 = arith.constant 0 : index
    %c0_6 = arith.constant 0 : index
    %5 = vector.load %arg4[%c0_4, %c0_5, %c0_6] : memref<1x8x1xf32, #tpu.memory_space<vmem>>, vector<1x8x1xf32>
    %6 = vector.shape_cast %5 : vector<1x8x1xf32> to vector<8x1xf32>
    %7 = arith.mulf %3, %4 : vector<8x256xf32>
    %cst = arith.constant dense<0.000000e+00> : vector<8xf32>
    %8 = vector.multi_reduction <add>, %7, %cst [1] : vector<8x256xf32> to vector<8xf32>
    %9 = vector.shape_cast %8 : vector<8xf32> to vector<8x1xf32>
    %10 = arith.addf %6, %9 : vector<8x1xf32>
    %c0_7 = arith.constant 0 : index
    %c0_8 = arith.constant 0 : index
    %c0_9 = arith.constant 0 : index
    %11 = vector.load %arg4[%c0_7, %c0_8, %c0_9] : memref<1x8x1xf32, #tpu.memory_space<vmem>>, vector<1x8x1xf32>
    %12 = vector.shape_cast %11 : vector<1x8x1xf32> to vector<8x1xf32>
    %13 = vector.shape_cast %10 : vector<8x1xf32> to vector<1x8x1xf32>
    tpu.vector_store %arg4[%c0_7, %c0_8, %c0_9], %13 {strides = array<i32>} : memref<1x8x1xf32, #tpu.memory_space<vmem>>, vector<1x8x1xf32>,
    %c0_10 = arith.constant 0 : index
    %c0_11 = arith.constant 0 : index
    %c0_12 = arith.constant 0 : index
    %14 = vector.load %arg5[%c0_10, %c0_11, %c0_12] : memref<1x8x1xf32, #tpu.memory_space<vmem>>, vector<1x8x1xf32>
    %15 = vector.shape_cast %14 : vector<1x8x1xf32> to vector<8x1xf32>
    %16 = arith.addf %3, %4 : vector<8x256xf32>
    %cst_13 = arith.constant dense<0.000000e+00> : vector<8xf32>
    %17 = vector.multi_reduction <add>, %16, %cst_13 [1] : vector<8x256xf32> to vector<8xf32>
    %18 = vector.shape_cast %17 : vector<8xf32> to vector<8x1xf32>
    %19 = arith.addf %15, %18 : vector<8x1xf32>
    %c0_14 = arith.constant 0 : index
    %c0_15 = arith.constant 0 : index
    %c0_16 = arith.constant 0 : index
    %20 = vector.load %arg5[%c0_14, %c0_15, %c0_16] : memref<1x8x1xf32, #tpu.memory_space<vmem>>, vector<1x8x1xf32>
    %21 = vector.shape_cast %20 : vector<1x8x1xf32> to vector<8x1xf32>
    %22 = vector.shape_cast %19 : vector<8x1xf32> to vector<1x8x1xf32>
    tpu.vector_store %arg5[%c0_14, %c0_15, %c0_16], %22 {strides = array<i32>} : memref<1x8x1xf32, #tpu.memory_space<vmem>>, vector<1x8x1xf32>,
    return
  }
  func.func @transform_0(%arg0: i32, %arg1: i32) -> (i32, i32) {
    %c1_i32 = arith.constant 1 : i32
    %0 = arith.muli %arg0, %c1_i32 : i32
    %1 = arith.addi %0, %arg1 : i32
    %c0_i32 = arith.constant 0 : i32
    %c0_i32_0 = arith.constant 0 : i32
    return %c0_i32, %1 : i32, i32
  }
  func.func @transform_1(%arg0: i32, %arg1: i32) -> (i32, i32) {
    %c1_i32 = arith.constant 1 : i32
    %0 = arith.muli %arg0, %c1_i32 : i32
    %1 = arith.addi %0, %arg1 : i32
    %c0_i32 = arith.constant 0 : i32
    %c0_i32_0 = arith.constant 0 : i32
    return %c0_i32, %1 : i32, i32
  }
  func.func @transform_2(%arg0: i32, %arg1: i32) -> (i32, i32, i32) {
    %c0_i32 = arith.constant 0 : i32
    %c0_i32_0 = arith.constant 0 : i32
    %c0_i32_1 = arith.constant 0 : i32
    return %arg0, %c0_i32, %c0_i32_0 : i32, i32, i32
  }
  func.func @transform_3(%arg0: i32, %arg1: i32) -> (i32, i32, i32) {
    %c0_i32 = arith.constant 0 : i32
    %c0_i32_0 = arith.constant 0 : i32
    %c0_i32_1 = arith.constant 0 : i32
    return %arg0, %c0_i32, %c0_i32_0 : i32, i32, i32
  }
}

</mosaic_0001>

<bundles_post_ra>
// kernel: tpu_custom_call.1
= control target key start
LH: loop header
LB: loop body
LE: loop exit
PB: predicated region body
PF: predicated region fallthrough
CT: control target
= control target key end

     0   :  { %9 = vsyncpa [#allocation3], 0  ;;  %s207_s0 = inlined_call_operand.hbm [shape: f32[8,256], index: 0, kind: input, shape index: {}]   ;;  %s208_s1 = inlined_call_operand.hbm [shape: f32[8,256], index: 1, kind: input, shape index: {}]   ;;  %s209_s2 = inlined_call_operand.vmem [shape: f32[1,8,1], index: 2, kind: output, shape index: {0}]   ;;  %s210_s3 = inlined_call_operand.vmem [shape: f32[1,8,1], index: 3, kind: output, shape index: {1}]  }
   0x1   :  { %10 = vsyncpa [#allocation5], 0  ;;  %s138_s12 = smov [#allocation2]   ;;  %s139_s14 = smov [#allocation4]  }
   0x2   :  { %s21_s13 = sshll.u32 %s138_s12, 4  ;;  %s35_s15 = sshll.u32 %s139_s14, 4  ;;  %s22_s13 = int_to_ptr.vmem [resolvable:$true] %s21_s13  ;;  %s36_s15 = int_to_ptr.vmem [resolvable:$true] %s35_s15 }
   0x3   :  { %s90_s18 = scalar_lea.hbm %s207_s0, 256 }
   0x4   :  { %p91_p0 = scmp.ne.s32.totalorder %s207_s0, %s90_s18  ;;  %p94_p1 = scmp.lt.u32.totalorder %s90_s18, %s207_s0 }
   0x6   :  { %p96_p2 = pnand %p94_p1, %p91_p0 }
   0x8   :  { %99 = shalt.err (!%p96_p2)
}
   0x9   :  { %s100_s23 = scalar_lea.vmem %s22_s13, 256  ;;  %p105_p4 = scmp.lt.s32.totalorder %s22_s13, %s22_s13 }
   0xa   :  { %p101_p3 = scmp.ne.s32.totalorder %s22_s13, %s100_s23  ;;  %p106_p5 = scmp.lt.s32.totalorder %s100_s23, %s100_s23 }
   0xc   :  { %p107_p6 = por %p106_p5, %p105_p4 }
   0xe   :  { %p108_p7 = pnand %p107_p6, %p101_p3 }
  0x10   :  { %111 = shalt.err (!%p108_p7)
}
  0x11   :  { %24 = dma.hbm_to_vmem [thread:$0]  %s207_s0, 256, %s22_s13, [#allocation3]  }
  0x12   :  { %s112_s28 = scalar_lea.hbm %s208_s1, 256 }
  0x13   :  { %p113_p8 = scmp.ne.s32.totalorder %s208_s1, %s112_s28  ;;  %p116_p9 = scmp.lt.u32.totalorder %s112_s28, %s208_s1 }
  0x15   :  { %p118_p10 = pnand %p116_p9, %p113_p8 }
  0x17   :  { %121 = shalt.err (!%p118_p10)
}
  0x18   :  { %s122_s6 = scalar_lea.vmem %s36_s15, 256  ;;  %p127_p12 = scmp.lt.s32.totalorder %s36_s15, %s36_s15 }
  0x19   :  { %p123_p11 = scmp.ne.s32.totalorder %s36_s15, %s122_s6  ;;  %p128_p13 = scmp.lt.s32.totalorder %s122_s6, %s122_s6 }
  0x1b   :  { %p129_p0 = por %p128_p13, %p127_p12 }
  0x1d   :  { %p130_p1 = pnand %p129_p0, %p123_p11 }
  0x1f   :  { %133 = shalt.err (!%p130_p1)
}
  0x20   :  { %38 = dma.hbm_to_vmem [thread:$0]  %s208_s1, 256, %s36_s15, [#allocation5]  }
  0x21   :  { %134 = dma.done.wait [#allocation3], 256  }
  0x22   :  { %135 = vsyncadd [#allocation3], 4294967040 }
  0x23   :  { %136 = dma.done.wait [#allocation5], 256  }
  0x24   :  { %137 = vsyncadd [#allocation5], 4294967040  ;;  %vm53_vm0 = vcmask 7168   ;;  %v140_v0 = vmov 0.0   ;;  %v56_v1 = vld [vmem:[#allocation2] sm:$0xff]  ;;  %v57_v2 = vld [vmem:[#allocation2 + $0x8] sm:$0xff] }
  0x25   :  { %54 = vst.msk [vmem:[%s209_s2] sm:$0xff] %vm53_vm0, %v140_v0  ;;  %55 = vst.msk [vmem:[%s210_s3] sm:$0xff] %vm53_vm0, %v140_v0  ;;  %v58_v3 = vld [vmem:[#allocation4] sm:$0xff]  ;;  %v59_v4 = vld [vmem:[#allocation4 + $0x8] sm:$0xff] }
  0x26   :  { %v61_v5 = vmul.f32 %v58_v3, %v56_v1  ;;  %v62_v6 = vmul.f32 %v59_v4, %v57_v2  ;;  %v70_v7 = vadd.f32 %v58_v3, %v56_v1  ;;  %v71_v8 = vadd.f32 %v59_v4, %v57_v2 }
  0x28   :  { %v63_v9 = vadd.f32 %v62_v6, %v61_v5  ;;  %v72_v10 = vadd.f32 %v71_v8, %v70_v7 }
  0x2a   :  { %64 = vadd.xlane.f32.xlu0 %v63_v9 }
  0x2c   :  { %v60_v11 = vld [vmem:[%s209_s2] sm:$0xff] }
  0x2d   :  { %v69_v14 = vld [vmem:[%s210_s3] sm:$0xff] }
  0x2e   :  { %73 = vadd.xlane.f32.xlu0 %v72_v10 }
  0xb7   :  { %v65_v12 = vpop.xlane.xlu0 %64 }
  0xb8   :  { %v66_v13 = vadd.f32 %v65_v12, %v60_v11 }
  0xba   :  { %68 = vst.msk [vmem:[%s209_s2] sm:$0xff] %vm53_vm0, %v66_v13 }
  0xbb   :  { %v74_v15 = vpop.xlane.xlu0 %73 }
  0xbc   :  { %v75_v16 = vadd.f32 %v74_v15, %v69_v14 }
  0xbe   :  { %76 = vst.msk [vmem:[%s210_s3] sm:$0xff] %vm53_vm0, %v75_v16 }
  0xbf   :  { %85 = vsyncpa [#allocation3], 1 }
  0xc0   :  { %86 = vsyncpa [#allocation5], 1 }

</bundles_post_ra>
